<compile_context>
chip_gen: v5e
topology: v5e:2x2
jax: 0.10.0
libtpu: 0.0.40
codegen_flags: <defaults>
</compile_context>

<pallas_src>
import math

import jax
import jax.numpy as jnp
from jax.experimental import pallas as pl
from jax.experimental.pallas import tpu as pltpu

_MAX_BLOCK_BYTES = 2 * 1024 * 1024     # 2 MiB per block -> 8 MiB double-buffered in flight
_VMEM_LIMIT_BYTES = 24 * 1024 * 1024   # explicit scoped-VMEM budget, safe on v5e/v6e/v7x
_LANE_CANDIDATES = (512, 256, 128)     # lane-dense (multiple of 128) -> unmasked full-width vst


def _round_up(a, b):
    return -(-a // b) * b


def _cdiv(a, b):
    return -(-a // b)


def _sublane_multiple(itemsize):
    # (8,128) min tile for 32-bit, (16,128) for 16-bit, (32,128) for 8-bit dtypes.
    return {4: 8, 2: 16, 1: 32}[itemsize]


def _choose_tiling(total, itemsize):
    """Pick (lane, rows, tile_rows) for a lane-dense (rows, lane) view, or None."""
    lane = next((c for c in _LANE_CANDIDATES if total % c == 0), None)
    if lane is None:
        return None
    rows = total // lane
    sub = _sublane_multiple(itemsize)
    max_rows = max(sub, (_MAX_BLOCK_BYTES // (lane * itemsize)) // sub * sub)
    if rows <= sub:
        tile_rows = rows                      # single block == full array dims (tiny input)
    elif rows <= 2 * max_rows:
        # Split into >= 2 blocks so both v7x TensorCores get work.
        tile_rows = _round_up(_cdiv(rows, 2), sub)
    else:
        tile_rows = max_rows
    return lane, rows, tile_rows


def _tiny_dip_kernel(params_ref, x_ref, o_ref):
    # params_ref: SMEM (3,) f32 = [alpha, beta, gamma]  (beta unused by forward())
    # x_ref / o_ref: VMEM (tile_rows, lane) lane-dense block
    alpha = params_ref[0]
    gamma = params_ref[2]
    xv = x_ref[...].astype(jnp.float32)
    # x ** gamma = exp(gamma * log(x)): two EUP ops/element, HBM-bound everywhere.
    o_ref[...] = (alpha * jnp.exp(gamma * jnp.log(xv))).astype(o_ref.dtype)


def tiny_dip_forward(x, alpha=1.1, beta=0.0, gamma=0.4):
    """TinyDIP.forward: out = alpha * x ** gamma, elementwise over (N, C, H, W)."""
    orig_shape = x.shape
    itemsize = jnp.dtype(x.dtype).itemsize
    total = math.prod(orig_shape)

    xf = x.reshape(-1)
    tiling = _choose_tiling(total, itemsize)
    n_pad = 0
    if tiling is None:
        # Rare fallback (total not a multiple of 128): pad the flat pixels with
        # 1.0 (finite under log/exp for any gamma) and slice the result back.
        padded_total = _round_up(total, _LANE_CANDIDATES[0])
        n_pad = padded_total - total
        xf = jnp.pad(xf, (0, n_pad), constant_values=1.0)
        tiling = _choose_tiling(padded_total, itemsize)
    lane, rows, tile_rows = tiling

    x2 = xf.reshape(rows, lane)
    params = jnp.asarray([alpha, beta, gamma], dtype=jnp.float32)
    n_blocks = _cdiv(rows, tile_rows)   # cdiv grid: Pallas handles the partial edge block

    out = pl.pallas_call(
        _tiny_dip_kernel,
        out_shape=jax.ShapeDtypeStruct((rows, lane), x.dtype),
        grid=(n_blocks,),
        in_specs=[
            pl.BlockSpec(memory_space=pltpu.MemorySpace.SMEM),   # params, SMEM-resident
            pl.BlockSpec((tile_rows, lane), lambda i: (i, 0)),
        ],
        out_specs=pl.BlockSpec((tile_rows, lane), lambda i: (i, 0)),
        compiler_params=pltpu.CompilerParams(
            dimension_semantics=("parallel",),
            vmem_limit_bytes=_VMEM_LIMIT_BYTES),
        cost_estimate=pl.CostEstimate(
            flops=2 * rows * lane,
            transcendentals=2 * rows * lane,
            bytes_accessed=2 * rows * lane * itemsize + 12),
    )(params, x2)

    out_flat = out.reshape(-1)
    if n_pad:
        out_flat = out_flat[:total]
    return out_flat.reshape(orig_shape)


def init_unused_tinydip_params(key):
    """conv1/conv2/linear1/linear2 parameters: defined by the module but never
    used by forward() (compute_params / soft_clip are dead code for forward)."""
    ks = jax.random.split(key, 4)
    return {
        "conv1_w": jax.random.normal(ks[0], (8, 3, 3, 3), jnp.float32) * 0.1,
        "conv1_b": jnp.zeros((8,), jnp.float32),
        "conv2_w": jax.random.normal(ks[1], (16, 8, 3, 3), jnp.float32) * 0.1,
        "conv2_b": jnp.zeros((16,), jnp.float32),
        "linear1_w": jax.random.normal(ks[2], (16, 16), jnp.float32) * 0.1,
        "linear1_b": jnp.zeros((16,), jnp.float32),
        "linear2_w": jax.random.normal(ks[3], (3, 16), jnp.float32) * 0.1,
        "linear2_b": jnp.zeros((3,), jnp.float32),
    }


if __name__ == "__main__":
    key = jax.random.PRNGKey(0)
    k1, k2, k3, kp = jax.random.split(key, 4)

    # Initialized but unused by forward(), exactly like the PyTorch module.
    _ = init_unused_tinydip_params(kp)

    # Case 1: f32, 2-block grid with a partial edge block.
    #   total = 2*3*32*32 = 6144 -> 12 rows x 512 lanes, tile_rows=8 -> blocks (8,512)+(4,512).
    x1 = jax.random.uniform(k1, (2, 3, 32, 32), jnp.float32, minval=1e-3, maxval=1.0)
    out1 = jax.block_until_ready(tiny_dip_forward(x1))
    ref1 = 1.1 * jnp.power(x1, 0.4)
    assert out1.shape == x1.shape and out1.dtype == x1.dtype
    assert bool(jnp.all(jnp.isfinite(out1)))  # edge-block padding rows never committed
    assert jnp.allclose(out1, ref1, rtol=1e-5, atol=1e-5), "mismatch (f32 edge-block path)"

    # Case 2: ragged total (2*3*5*7 = 210, not a multiple of 128) -> pad-fallback path.
    x2 = jax.random.uniform(k2, (2, 3, 5, 7), jnp.float32, minval=1e-3, maxval=1.0)
    out2 = jax.block_until_ready(tiny_dip_forward(x2))
    ref2 = 1.1 * jnp.power(x2, 0.4)
    assert out2.shape == x2.shape and out2.dtype == x2.dtype
    assert jnp.allclose(out2, ref2, rtol=1e-5, atol=1e-5), "mismatch (pad-fallback path)"

    # Case 3: bf16 I/O path (f32 compute inside the kernel), 16-row sublane rule.
    x3 = jax.random.uniform(k3, (2, 4, 16, 16), jnp.float32, minval=1e-3, maxval=1.0
                            ).astype(jnp.bfloat16)
    out3 = jax.block_until_ready(tiny_dip_forward(x3))
    ref3 = (1.1 * jnp.power(x3.astype(jnp.float32), 0.4)).astype(jnp.bfloat16)
    assert out3.shape == x3.shape and out3.dtype == x3.dtype
    assert jnp.allclose(out3.astype(jnp.float32), ref3.astype(jnp.float32),
                        rtol=2e-2, atol=2e-2), "mismatch (bf16 path)"

    print("KERNEL_OK")
</pallas_src>

<mosaic_0001>
module attributes {stable_mosaic.version = 11 : i64} {
  func.func @_tiny_dip_kernel(%arg0: i32, %arg1: memref<3xf32, #tpu.memory_space<smem>>, %arg2: memref<8x512xf32, #tpu.memory_space<vmem>>, %arg3: memref<8x512xf32, #tpu.memory_space<vmem>>) attributes {dimension_semantics = [#tpu.dimension_semantics<parallel>], iteration_bounds = array<i64: 2>, scalar_prefetch = 0 : i64, scratch_operands = 0 : i64, tpu.core_type = #tpu.core_type<tc>, window_params = [{transform_indices = @transform_0, window_bounds = array<i64: 3>}, {transform_indices = @transform_1, window_bounds = array<i64: 8, 512>}, {transform_indices = @transform_2, window_bounds = array<i64: 8, 512>}]} {
    %c0 = arith.constant 0 : index
    %0 = memref.load %arg1[%c0] : memref<3xf32, #tpu.memory_space<smem>>
    %c2 = arith.constant 2 : index
    %1 = memref.load %arg1[%c2] : memref<3xf32, #tpu.memory_space<smem>>
    %c0_0 = arith.constant 0 : index
    %c0_1 = arith.constant 0 : index
    %2 = vector.load %arg2[%c0_0, %c0_1] : memref<8x512xf32, #tpu.memory_space<vmem>>, vector<8x512xf32>
    %3 = math.log %2 : vector<8x512xf32>
    %4 = vector.broadcast %1 : f32 to vector<8x512xf32>
    %5 = arith.mulf %4, %3 : vector<8x512xf32>
    %6 = math.exp %5 : vector<8x512xf32>
    %7 = vector.broadcast %0 : f32 to vector<8x512xf32>
    %8 = arith.mulf %7, %6 : vector<8x512xf32>
    %c0_2 = arith.constant 0 : index
    %c0_3 = arith.constant 0 : index
    %9 = vector.load %arg3[%c0_2, %c0_3] : memref<8x512xf32, #tpu.memory_space<vmem>>, vector<8x512xf32>
    tpu.vector_store %arg3[%c0_2, %c0_3], %8 {strides = array<i32>} : memref<8x512xf32, #tpu.memory_space<vmem>>, vector<8x512xf32>,
    return
  }
  func.func @transform_0(%arg0: i32) -> i32 {
    %c0_i32 = arith.constant 0 : i32
    %c0_i32_0 = arith.constant 0 : i32
    return %c0_i32 : i32
  }
  func.func @transform_1(%arg0: i32) -> (i32, i32) {
    %c0_i32 = arith.constant 0 : i32
    %c0_i32_0 = arith.constant 0 : i32
    return %arg0, %c0_i32 : i32, i32
  }
  func.func @transform_2(%arg0: i32) -> (i32, i32) {
    %c0_i32 = arith.constant 0 : i32
    %c0_i32_0 = arith.constant 0 : i32
    return %arg0, %c0_i32 : i32, i32
  }
}

</mosaic_0001>

<bundles_post_ra>
// kernel: tpu_custom_call.1
= control target key start
LH: loop header
LB: loop body
LE: loop exit
PB: predicated region body
PF: predicated region fallthrough
CT: control target
= control target key end

     0   :  { %7 = vsyncpa [#allocation5], 0  ;;  %s678_s0 = inlined_call_operand.hbm [shape: f32[3], index: 0, kind: input, shape index: {}]   ;;  %s679_s1 = inlined_call_operand.hbm [shape: f32[12,512], index: 1, kind: input, shape index: {}]   ;;  %s680_s2 = inlined_call_operand.hbm [shape: f32[12,512], index: 2, kind: output, shape index: {}]  }
   0x1   :  { %8 = vsyncpa [#allocation3], 0 }
   0x2   :  { %10 = vsyncpa [#allocation3 + $0x1], 0 }
   0x3   :  { %11 = vsyncpa [#allocation4], 0 }
   0x4   :  { %13 = vsyncpa [#allocation4 + $0x1], 0  ;;  %s536_s9 = smov 0   ;;  %s538_s10 = smov 0  }
   0x5   :  { %s540_s11 = smov 0   ;;  %s542_s12 = smov 0  }
   0x6 LB: > { %s557_s13 = sadd.s32 4294967295, %s518_s12   ;;  %s311_s14 = sadd.s32 4294967294, %s518_s12   ;;  %s518_s12 = sphi %s542_s12, %s690_s12   ;;  %s514_s11 = sphi %s540_s11, %s689_s11   ;;  %s510_s10 = sphi %s538_s10, %s688_s10   ;;  %s506_s9 = sphi %s536_s9, %s687_s9  }
   0x7   : > { %p60_p0 = scmp.ne.s32.totalorder %s510_s10, %s506_s9  ;;  %p61_p1 = scmp.eq.s32.totalorder %s557_s13, 0 }
   0x8   : > { %p84_p2 = scmp.eq.s32.totalorder %s557_s13, 1  ;;  %p90_p3 = scmp.eq.s32.totalorder %s311_s14, 1 }
   0x9   : > { %p566_p4 = por %p61_p1, %p60_p0  ;;  %p312_p5 = scmp.ge.s32.totalorder %s518_s12, 1 }
   0xa   : > { %p571_p6 = por %p90_p3, %p60_p0  ;;  %p97_p7 = scmp.lt.s32.totalorder %s518_s12, 3 }
   0xb   : > { %s109_s19 = sshll.u32 %s678_s0, 4  ;;  %s587_s21 = sadd.s32 1, %s518_s12   ;;  %s110_s19 = int_to_ptr.hbm [resolvable:$true] %s109_s19 }
   0xc   : > { %p579_p8 = pnand %p312_p5, %p97_p7  ;;  %s44_s22 = ssub.s32 %s518_s12, %s587_s21 }
   0xd   : > { %p45_p12 = scmp.eq.s32.totalorder %s44_s22, 0  ;;  %s47_s23 = sadd.s32 1, %s514_s11 }
   0xe   : > { %p338_p10 = pneg %p579_p8  ;;  %p54_p13 = scmp.ne.s32.totalorder %s514_s11, %s510_s10 }
   0xf   : > { %s520_s24 = smov [#allocation2]   ;;  %p55_p0 = scmp.eq.s32.totalorder %s518_s12, 0 }
  0x10   : > { %p339_p11 = pnand %p338_p10, %p61_p1  ;;  %p602_p3 = por %p84_p2, %p54_p13 }
  0x11   : > { %s597_s25 = scalar_select %p45_p12, %s514_s11, %s47_s23  }
  0x12   : > { %341 = dma.hbm_to_smem (!%p339_p11), %s110_s19, 16, %s520_s24, [#allocation5]  }
  0x13   : > { %s120_s27 = sand.u32 1, %s514_s11   ;;  %p56_p5 = por %p55_p0, %p54_p13 }
  0x14   : > { %p351_p7 = scmp.lt.s32.totalorder %s518_s12, 2  ;;  %s315_s28 = sshll.u32 %s120_s27, 5 }
  0x15   : > { %s328_s29 = sshll.u32 %s518_s12, 5  ;;  %s124_s6 = scalar_lea.vmem [#allocation6], %s315_s28 }
  0x16   : > { %s129_s4 = scalar_lea.hbm %s679_s1, %s328_s29  ;;  %s133_s7 = sshll.u32 %s124_s6, 4  ;;  %s134_s7 = int_to_ptr.vmem [resolvable:$true] %s133_s7 }
  0x17   : > { %s131_s5 = sshll.u32 %s129_s4, 4  ;;  %p612_p10 = pnand %p351_p7, %p56_p5  ;;  %s132_s5 = int_to_ptr.hbm [resolvable:$true] %s131_s5 }
  0x18   : > { %s121_s14 = scalar_lea.sflag [#allocation3], %s120_s27  ;;  %s418_s17 = sshra.s32 %s132_s5, 4  ;;  %s419_s17 = int_to_ptr.hbm [resolvable:$true] %s418_s17 }
  0x19   : > { %s420_s18 = scalar_lea.hbm %s419_s17, 32  ;;  %p422_p11 = pneg %p612_p10 }
  0x1a   : > { %p421_p2 = scmp.ne.s32.totalorder %s419_s17, %s420_s18  ;;  %s425_s23 = scalar_lea.hbm %s679_s1, 64 }
  0x1b   : > { %p426_p0 = scmp.lt.s32.totalorder %s419_s17, %s679_s1  ;;  %p427_p5 = scmp.lt.s32.totalorder %s425_s23, %s420_s18 }
  0x1c   : > { %p423_p12 = pnand %p422_p11, %p421_p2 }
  0x1d   : > { %p428_p7 = por %p427_p5, %p426_p0 }
  0x1e   : > { %p424_p13 = pneg %p423_p12 }
  0x20   : > { %p429_p9 = pnand %p428_p7, %p424_p13 }
  0x22   : > { %432 = shalt.err (!%p429_p9)
}
  0x23   : > { %345 = dma.hbm_to_vmem [thread:$0]  (!%p612_p10), %s132_s5, 512, %s134_s7, %s121_s14  }
  0x24   : > { %142 = sbr.rel (%p579_p8) target bundleno = 77 (0x4d), region = 28 }
  0x29   : > { %493 = dma.done.wait (%p61_p1), [#allocation5], 16  }
  0x2a   : > { %495 = vsyncadd (%p61_p1), [#allocation5], 4294967280  ;;  %s633_s27 = sand.u32 1, %s510_s10  }
  0x2b   : > { %s320_s29 = sshll.u32 %s633_s27, 5  ;;  %s150_s30 = scalar_lea.sflag [#allocation3], %s633_s27 }
  0x2c   : > { %s153_s3 = scalar_lea.vmem [#allocation6], %s320_s29 }
  0x2d   : > { %497 = dma.done.wait (%p566_p4), %s150_s30, 512  }
  0x2e   : > { %499 = vsyncadd (%p566_p4), %s150_s30, 4294966784 }
  0x2f   : > { %159 = sfence }
  0x30   : > { %v178_v0 = vld [vmem:[%s153_s3] sm:$0xff]  ;;  %v179_v1 = vld [vmem:[%s153_s3 + $0x8] sm:$0xff]  ;;  %v180_v2 = vld [vmem:[%s153_s3 + $0x10] sm:$0xff]  ;;  %s322_s20 = sld [smem:[#allocation2 + $0x2]]  ;;  %s329_s4 = sshll.u32 %s557_s13, 5 }
  0x31   : > { %387 = vlog2.f32 %v178_v0  ;;  %v181_v3 = vld [vmem:[%s153_s3 + $0x18] sm:$0xff]  ;;  %s176_s15 = sld [smem:[#allocation2]]  ;;  %s224_s7 = scalar_lea.hbm %s680_s2, %s329_s4 }
  0x32   : > { %389 = vlog2.f32 %v179_v1  ;;  %s175_s8 = scalar_lea.vmem [#allocation7], %s320_s29  ;;  %s228_s17 = sshll.u32 %s224_s7, 4  ;;  %s229_s17 = int_to_ptr.hbm [resolvable:$true] %s228_s17 }
  0x33   : > { %391 = vlog2.f32 %v180_v2  ;;  %s226_s14 = sshll.u32 %s175_s8, 4  ;;  %s213_s13 = scalar_lea.sflag [#allocation4], %s633_s27  ;;  %s227_s14 = int_to_ptr.vmem [resolvable:$true] %s226_s14 }
  0x34   : > { %393 = vlog2.f32 %v181_v3  ;;  %s462_s18 = sshra.s32 %s229_s17, 4  ;;  %s468_s24 = scalar_lea.hbm %s680_s2, 64  ;;  %s463_s18 = int_to_ptr.hbm [resolvable:$true] %s462_s18 }
  0x35   : > { %s464_s19 = scalar_lea.hbm %s463_s18, 32  ;;  %p469_p9 = scmp.lt.s32.totalorder %s463_s18, %s680_s2 }
  0x36   : > { %v190_v5 = vstv %s322_s20  ;;  %p465_p1 = scmp.ne.s32.totalorder %s463_s18, %s464_s19  ;;  %p470_p10 = scmp.lt.s32.totalorder %s468_s24, %s464_s19 }
  0x37   : > { %v388_v4 = vpop.eup %387  ;;  %v203_v21 = vstv %s176_s15 }
  0x38   : > { %v390_v6 = vpop.eup %389  ;;  %v183_v7 = vmul.f32 0.6931472, %v388_v4  ;;  %p466_p4 = pnand %p465_p1, %p602_p3  ;;  %p471_p2 = por %p470_p10, %p469_p9 }
  0x39   : > { %v392_v8 = vpop.eup %391  ;;  %v185_v9 = vmul.f32 0.6931472, %v390_v6 }
  0x3a   : > { %v394_v10 = vpop.eup %393  ;;  %v191_v11 = vmul.f32 %v190_v5, %v183_v7  ;;  %v187_v12 = vmul.f32 0.6931472, %v392_v8  ;;  %p467_p8 = pneg %p466_p4 }
  0x3b   : > { %v192_v13 = vmul.f32 %v190_v5, %v185_v9  ;;  %v189_v14 = vmul.f32 0.6931472, %v394_v10 }
  0x3c   : > { %v195_v15 = vmul.f32 1.442695, %v191_v11  ;;  %v193_v16 = vmul.f32 %v190_v5, %v187_v12  ;;  %p472_p11 = pnand %p471_p2, %p467_p8 }
  0x3d   : > { %v197_v17 = vmul.f32 1.442695, %v192_v13  ;;  %v194_v18 = vmul.f32 %v190_v5, %v189_v14 }
  0x3e   : > { %395 = vpow2.f32 %v195_v15  ;;  %v199_v19 = vmul.f32 1.442695, %v193_v16 }
  0x3f   : > { %397 = vpow2.f32 %v197_v17  ;;  %v201_v20 = vmul.f32 1.442695, %v194_v18 }
  0x40   : > { %399 = vpow2.f32 %v199_v19 }
  0x41   : > { %401 = vpow2.f32 %v201_v20 }
  0x44   : > { %v396_v22 = vpop.eup %395 }
  0x45   : > { %v398_v23 = vpop.eup %397  ;;  %v204_v24 = vmul.f32 %v396_v22, %v203_v21 }
  0x46   : > { %v400_v25 = vpop.eup %399  ;;  %v205_v26 = vmul.f32 %v398_v23, %v203_v21 }
  0x47   : > { %v402_v27 = vpop.eup %401  ;;  %208 = vst [vmem:[%s175_s8] sm:$0xff] %v204_v24  ;;  %v206_v28 = vmul.f32 %v400_v25, %v203_v21 }
  0x48   : > { %209 = vst [vmem:[%s175_s8 + $0x8] sm:$0xff] %v205_v26  ;;  %v207_v29 = vmul.f32 %v402_v27, %v203_v21 }
  0x49   : > { %210 = vst [vmem:[%s175_s8 + $0x10] sm:$0xff] %v206_v28 }
  0x4a   : > { %211 = vst [vmem:[%s175_s8 + $0x18] sm:$0xff] %v207_v29 }
  0x4b   : > { %475 = shalt.err (!%p472_p11)
}
  0x4c   : > { %336 = dma.vmem_to_hbm [thread:$0]  (%p602_p3), %s227_s14, 512, %s229_s17, %s213_s13  }
  0x4d PF: > { %s240_s27 = sand.u32 1, %s506_s9   ;;  %p686_p12 = scmp.ge.s32.totalorder %s518_s12, 2 }
  0x4e   : > { %s241_s30 = scalar_lea.sflag [#allocation4], %s240_s27 }
  0x4f   : > { %p347_p13 = pnand %p686_p12, %p571_p6 }
  0x51   : > { %p348_p0 = pneg %p347_p13 }
  0x53   : > { %501 = dma.done.wait (%p348_p0), %s241_s30, 512  }
  0x54   : > { %503 = vsyncadd (%p348_p0), %s241_s30, 4294966784  ;;  %p16_p5 = scmp.ge.s32.totalorder %s587_s21, 4   ;;  %s687_s9 = smov %s510_s10 }
  0x55   : > { %s688_s10 = smov %s514_s11  ;;  %s689_s11 = smov %s597_s25 }
  0x56   : > { %s690_s12 = smov %s587_s21  ;;  %18 = sbr.rel (!%p16_p5) target bundleno = 6 (0x6), region = 78 }
  0x5b   :  { %247 = vsyncpa [#allocation3], 1 }
  0x5c   :  { %249 = vsyncpa [#allocation3 + $0x1], 1 }
  0x5d   :  { %250 = vsyncpa [#allocation4], 1 }
  0x5e   :  { %252 = vsyncpa [#allocation4 + $0x1], 1 }
  0x5f   :  { %253 = vsyncpa [#allocation5], 1 }
  0x60   :  { %255 = vsyncpa [#allocation5 + $0x1], 1 }

</bundles_post_ra>
